<compile_context>
chip_gen: v5e
topology: v5e:2x2
jax: 0.10.0
libtpu: 0.0.40
codegen_flags: <defaults>
</compile_context>

<pallas_src>
import functools
import math

import jax
import jax.numpy as jnp
from jax.experimental import pallas as pl
from jax.experimental.pallas import tpu as pltpu


def _pma_kernel(q_ref, qbd_ref, mask_ref, wk_ref, bk_ref, wv_ref, bv_ref,
                wot_ref, bo_ref, x_ref, o_ref, *, num_heads, num_seeds):
    tb, n, dim = x_ref.shape
    hs = num_heads * num_seeds
    cd = x_ref.dtype                       # MXU input dtype (bf16 in production path)

    # ---- K / V projections: one tile-wide matmul each (rows = tb*n, 128-deep) ----
    x_flat = x_ref[...].reshape(tb * n, dim)            # free leading-dim merge
    k_flat = jnp.einsum('mi,ci->mc', x_flat, wk_ref[...],
                        preferred_element_type=jnp.float32) + bk_ref[...]
    v_flat = jnp.einsum('mi,ci->mc', x_flat, wv_ref[...],
                        preferred_element_type=jnp.float32) + bv_ref[...]
    k = k_flat.astype(cd).reshape(tb, n, dim)
    v = v_flat.astype(cd).reshape(tb, n, dim)

    # ---- scores via block-diagonal pre-scaled Q: full 128-deep contraction ----
    qbd = jnp.broadcast_to(qbd_ref[...][None], (tb, hs, dim))       # hoisted, once per tile
    scores = jnp.einsum('bqd,bnd->bqn', qbd, k,
                        preferred_element_type=jnp.float32)         # (tb, H*S, n) f32
    m = jnp.max(scores, axis=-1, keepdims=True)
    e = jnp.exp(scores - m)
    denom = jnp.sum(e, axis=-1, keepdims=True)
    # Deferred softmax normalization; reciprocal on the EUP slot.
    ctx = jnp.einsum('bqn,bnd->bqd', e.astype(cd), v,
                     preferred_element_type=jnp.float32)            # (tb, H*S, dim) f32
    ctx = ctx * pl.reciprocal(denom, approx=True)

    # ---- merge heads back onto the lane axis with 0/1 masks (VPU, lane-dense) ----
    mask = mask_ref[...]                                            # (H, dim) f32
    attn = jnp.zeros((tb, num_seeds, dim), jnp.float32)
    for h in range(num_heads):        # tiny static unroll; sublane-aligned slices
        attn = attn + (ctx[:, h * num_seeds:(h + 1) * num_seeds, :]
                       * mask[h:h + 1][None])                       # (1,1,dim) broadcast

    # ---- residual + fc_o epilogue as one (tb*S, dim) matmul ----
    o = q_ref[...][None] + attn                                     # (tb, S, dim) f32
    o_flat = o.reshape(tb * num_seeds, dim)
    h_out = jnp.dot(o_flat.astype(cd), wot_ref[...],
                    preferred_element_type=jnp.float32) + bo_ref[...]
    o_flat = o_flat + jax.nn.relu(h_out)
    o_ref[...] = o_flat.reshape(tb, num_seeds, dim).astype(o_ref.dtype)


def _pick_block_b(batch):
    """Largest batch tile dividing B that keeps >= 2 grid steps (v7x megacore)."""
    for tb in (64, 32, 16, 8, 4, 2):
        if batch % tb == 0 and batch // tb >= 2:
            return tb
    return 1


def pma_forward(params, x, *, num_heads, block_b=None, compute_dtype=jnp.bfloat16):
    batch, n, dim = x.shape
    num_seeds = params["S"].shape[0]
    assert dim % num_heads == 0
    ds = dim // num_heads
    tb = block_b if block_b is not None else _pick_block_b(batch)
    assert batch % tb == 0

    f32 = jnp.float32
    cd = compute_dtype

    # Batch-invariant Q projection, hoisted out of the kernel (computed once, f32).
    q = (jnp.dot(params["S"].astype(f32), params["Wq"].T.astype(f32))
         + params["bq"].astype(f32))                                   # (S, dim)

    # Head-selection mask: mask[h, d] = 1 iff lane d belongs to head h.
    lane = jax.lax.broadcasted_iota(jnp.int32, (num_heads, dim), 1)
    head = jax.lax.broadcasted_iota(jnp.int32, (num_heads, dim), 0)
    head_mask = (lane // ds == head).astype(f32)                       # (H, dim)

    # Block-diagonal, pre-scaled Q: row h*S+s = Q[s] masked to head-h lanes / sqrt(dim).
    q_bd = (q[None, :, :] * head_mask[:, None, :] * (1.0 / math.sqrt(dim))
            ).reshape(num_heads * num_seeds, dim).astype(cd)           # (H*S, dim)

    # bf16 weights for the MXU; biases stay f32 rows added to f32 accumulators.
    wk = params["Wk"].astype(cd)
    wv = params["Wv"].astype(cd)
    wo_t = params["Wo"].T.astype(cd)                                   # pre-transposed
    bk = params["bk"].reshape(1, dim).astype(f32)
    bv = params["bv"].reshape(1, dim).astype(f32)
    bo = params["bo"].reshape(1, dim).astype(f32)
    x_c = x.astype(cd)

    kernel = functools.partial(_pma_kernel, num_heads=num_heads, num_seeds=num_seeds)
    const = lambda shape: pl.BlockSpec(shape, lambda i, s=len(shape): (0,) * s)

    return pl.pallas_call(
        kernel,
        out_shape=jax.ShapeDtypeStruct((batch, num_seeds, dim), x.dtype),
        grid_spec=pltpu.PrefetchScalarGridSpec(
            num_scalar_prefetch=0,
            grid=(batch // tb,),
            in_specs=[
                const((num_seeds, dim)),                  # q (residual, f32)
                const((num_heads * num_seeds, dim)),      # block-diag scaled Q (bf16)
                const((num_heads, dim)),                  # head mask (f32)
                const((dim, dim)),                        # Wk (bf16)
                const((1, dim)),                          # bk row (f32)
                const((dim, dim)),                        # Wv (bf16)
                const((1, dim)),                          # bv row (f32)
                const((dim, dim)),                        # Wo.T (bf16)
                const((1, dim)),                          # bo row (f32)
                pl.BlockSpec((tb, n, dim), lambda i: (i, 0, 0)),       # X tile
            ],
            out_specs=pl.BlockSpec((tb, num_seeds, dim), lambda i: (i, 0, 0)),
        ),
        compiler_params=pltpu.CompilerParams(
            dimension_semantics=("parallel",)),
    )(q, q_bd, head_mask, wk, bk, wv, bv, wo_t, bo, x_c)


def pma_reference(params, x, *, num_heads):
    """Pure-JAX f32 reference reproducing the PyTorch forward exactly."""
    B, N, dim = x.shape
    S = jnp.broadcast_to(params["S"][None], (B,) + params["S"].shape)  # (B, S_, dim)
    Q = S @ params["Wq"].T + params["bq"]
    K = x @ params["Wk"].T + params["bk"]
    V = x @ params["Wv"].T + params["bv"]
    ds = dim // num_heads

    def split_heads(t):  # torch.cat(t.split(ds, 2), 0)
        return jnp.concatenate([t[..., h * ds:(h + 1) * ds] for h in range(num_heads)], axis=0)

    Q_, K_, V_ = split_heads(Q), split_heads(K), split_heads(V)
    A = jax.nn.softmax(Q_ @ jnp.swapaxes(K_, 1, 2) / math.sqrt(dim), axis=2)
    O_ = Q_ + A @ V_
    O = jnp.concatenate([O_[h * B:(h + 1) * B] for h in range(num_heads)], axis=2)
    O = O + jax.nn.relu(O @ params["Wo"].T + params["bo"])
    return O


def init_params(key, dim, num_seeds):
    ks = jax.random.split(key, 9)
    xav = math.sqrt(6.0 / (num_seeds + dim))
    lim = 1.0 / math.sqrt(dim)
    u = lambda k, shape, a: jax.random.uniform(k, shape, jnp.float32, -a, a)
    return {
        "S":  u(ks[0], (num_seeds, dim), xav),
        "Wq": u(ks[1], (dim, dim), lim), "bq": u(ks[2], (1, dim), lim),
        "Wk": u(ks[3], (dim, dim), lim), "bk": u(ks[4], (1, dim), lim),
        "Wv": u(ks[5], (dim, dim), lim), "bv": u(ks[6], (1, dim), lim),
        "Wo": u(ks[7], (dim, dim), lim), "bo": u(ks[8], (1, dim), lim),
    }


if __name__ == "__main__":
    B, N, DIM = 4, 16, 128            # DIM=128 -> lane-dense output blocks
    NUM_HEADS, NUM_SEEDS = 4, 8

    key = jax.random.PRNGKey(0)
    kp, kx = jax.random.split(key)
    params = init_params(kp, DIM, NUM_SEEDS)
    x = jax.random.normal(kx, (B, N, DIM), jnp.float32)

    out = pma_forward(params, x, num_heads=NUM_HEADS)   # bf16 MXU path, f32 accumulation
    out = jax.block_until_ready(out)

    ref = pma_reference(params, x, num_heads=NUM_HEADS)
    assert out.shape == (B, NUM_SEEDS, DIM)
    # Tolerance loosened for bf16 MXU inputs + EUP approx-reciprocal softmax normalization
    # (accumulation and softmax statistics remain f32; the algebra itself is exact).
    assert jnp.allclose(out, ref, atol=5e-2, rtol=5e-2), "mismatch vs reference"
    print("KERNEL_OK")
</pallas_src>

<mosaic_0001>
module attributes {stable_mosaic.version = 11 : i64} {
  func.func @_pma_kernel(%arg0: i32, %arg1: memref<8x128xf32, #tpu.memory_space<vmem>>, %arg2: memref<32x128xbf16, #tpu.memory_space<vmem>>, %arg3: memref<4x128xf32, #tpu.memory_space<vmem>>, %arg4: memref<128x128xbf16, #tpu.memory_space<vmem>>, %arg5: memref<1x128xf32, #tpu.memory_space<vmem>>, %arg6: memref<128x128xbf16, #tpu.memory_space<vmem>>, %arg7: memref<1x128xf32, #tpu.memory_space<vmem>>, %arg8: memref<128x128xbf16, #tpu.memory_space<vmem>>, %arg9: memref<1x128xf32, #tpu.memory_space<vmem>>, %arg10: memref<2x16x128xbf16, #tpu.memory_space<vmem>>, %arg11: memref<2x8x128xf32, #tpu.memory_space<vmem>>) attributes {dimension_semantics = [#tpu.dimension_semantics<parallel>], iteration_bounds = array<i64: 2>, scalar_prefetch = 0 : i64, scratch_operands = 0 : i64, tpu.core_type = #tpu.core_type<tc>, window_params = [{pipeline_mode = #tpu.pipeline_mode<synchronous>, transform_indices = @transform_0, window_bounds = array<i64: 8, 128>}, {pipeline_mode = #tpu.pipeline_mode<synchronous>, transform_indices = @transform_1, window_bounds = array<i64: 32, 128>}, {pipeline_mode = #tpu.pipeline_mode<synchronous>, transform_indices = @transform_2, window_bounds = array<i64: 4, 128>}, {pipeline_mode = #tpu.pipeline_mode<synchronous>, transform_indices = @transform_3, window_bounds = array<i64: 128, 128>}, {pipeline_mode = #tpu.pipeline_mode<synchronous>, transform_indices = @transform_4, window_bounds = array<i64: 1, 128>}, {pipeline_mode = #tpu.pipeline_mode<synchronous>, transform_indices = @transform_5, window_bounds = array<i64: 128, 128>}, {pipeline_mode = #tpu.pipeline_mode<synchronous>, transform_indices = @transform_6, window_bounds = array<i64: 1, 128>}, {pipeline_mode = #tpu.pipeline_mode<synchronous>, transform_indices = @transform_7, window_bounds = array<i64: 128, 128>}, {pipeline_mode = #tpu.pipeline_mode<synchronous>, transform_indices = @transform_8, window_bounds = array<i64: 1, 128>}, {transform_indices = @transform_9, window_bounds = array<i64: 2, 16, 128>}, {transform_indices = @transform_10, window_bounds = array<i64: 2, 8, 128>}]} {
    %c0 = arith.constant 0 : index
    %c0_0 = arith.constant 0 : index
    %c0_1 = arith.constant 0 : index
    %0 = vector.load %arg10[%c0, %c0_0, %c0_1] : memref<2x16x128xbf16, #tpu.memory_space<vmem>>, vector<2x16x128xbf16>
    %1 = vector.shape_cast %0 : vector<2x16x128xbf16> to vector<32x128xbf16>
    %c0_2 = arith.constant 0 : index
    %c0_3 = arith.constant 0 : index
    %2 = vector.load %arg4[%c0_2, %c0_3] : memref<128x128xbf16, #tpu.memory_space<vmem>>, vector<128x128xbf16>
    "tpu.trace_start"() <{level = 10 : i32, message = "mi,ci->mc"}> : () -> ()
    %cst = arith.constant dense<0.000000e+00> : vector<32x128xf32>
    %3 = tpu.matmul %1, %2, %cst {dimension_numbers = #tpu.dot_dimension_numbers<[1], [1], [0], [0], [0, 0, 1, 0], [], []>} : vector<32x128xbf16>, vector<128x128xbf16>, vector<32x128xf32> -> vector<32x128xf32>
    "tpu.trace_stop"() : () -> ()
    %c0_4 = arith.constant 0 : index
    %c0_5 = arith.constant 0 : index
    %4 = vector.load %arg5[%c0_4, %c0_5] : memref<1x128xf32, #tpu.memory_space<vmem>>, vector<1x128xf32>
    %5 = vector.broadcast %4 : vector<1x128xf32> to vector<32x128xf32>
    %6 = arith.addf %3, %5 : vector<32x128xf32>
    %c0_6 = arith.constant 0 : index
    %c0_7 = arith.constant 0 : index
    %7 = vector.load %arg6[%c0_6, %c0_7] : memref<128x128xbf16, #tpu.memory_space<vmem>>, vector<128x128xbf16>
    "tpu.trace_start"() <{level = 10 : i32, message = "mi,ci->mc"}> : () -> ()
    %cst_8 = arith.constant dense<0.000000e+00> : vector<32x128xf32>
    %8 = tpu.matmul %1, %7, %cst_8 {dimension_numbers = #tpu.dot_dimension_numbers<[1], [1], [0], [0], [0, 0, 1, 0], [], []>} : vector<32x128xbf16>, vector<128x128xbf16>, vector<32x128xf32> -> vector<32x128xf32>
    "tpu.trace_stop"() : () -> ()
    %c0_9 = arith.constant 0 : index
    %c0_10 = arith.constant 0 : index
    %9 = vector.load %arg7[%c0_9, %c0_10] : memref<1x128xf32, #tpu.memory_space<vmem>>, vector<1x128xf32>
    %10 = vector.broadcast %9 : vector<1x128xf32> to vector<32x128xf32>
    %11 = arith.addf %8, %10 : vector<32x128xf32>
    %12 = arith.truncf %6 : vector<32x128xf32> to vector<32x128xbf16>
    %13 = vector.shape_cast %12 : vector<32x128xbf16> to vector<2x16x128xbf16>
    %14 = arith.truncf %11 : vector<32x128xf32> to vector<32x128xbf16>
    %15 = vector.shape_cast %14 : vector<32x128xbf16> to vector<2x16x128xbf16>
    %c0_11 = arith.constant 0 : index
    %c0_12 = arith.constant 0 : index
    %16 = vector.load %arg2[%c0_11, %c0_12] : memref<32x128xbf16, #tpu.memory_space<vmem>>, vector<32x128xbf16>
    %17 = vector.shape_cast %16 : vector<32x128xbf16> to vector<1x32x128xbf16>
    %18 = vector.shape_cast %17 : vector<1x32x128xbf16> to vector<1x32x128xbf16>
    %19 = vector.broadcast %18 : vector<1x32x128xbf16> to vector<2x32x128xbf16>
    "tpu.trace_start"() <{level = 10 : i32, message = "bqd,bnd->bqn"}> : () -> ()
    %cst_13 = arith.constant dense<0.000000e+00> : vector<2x32x16xf32>
    %20 = tpu.matmul %19, %13, %cst_13 {dimension_numbers = #tpu.dot_dimension_numbers<[2], [2], [1], [1], [0, 0, 0, 1, 1, 1], [0], [0]>} : vector<2x32x128xbf16>, vector<2x16x128xbf16>, vector<2x32x16xf32> -> vector<2x32x16xf32>
    "tpu.trace_stop"() : () -> ()
    %cst_14 = arith.constant dense<0xFF800000> : vector<2x32xf32>
    %21 = vector.multi_reduction <maximumf>, %20, %cst_14 [2] : vector<2x32x16xf32> to vector<2x32xf32>
    %22 = vector.shape_cast %21 : vector<2x32xf32> to vector<2x32x1xf32>
    %23 = vector.broadcast %22 : vector<2x32x1xf32> to vector<2x32x16xf32>
    %24 = arith.subf %20, %23 : vector<2x32x16xf32>
    %25 = math.exp %24 : vector<2x32x16xf32>
    %cst_15 = arith.constant dense<0.000000e+00> : vector<2x32xf32>
    %26 = vector.multi_reduction <add>, %25, %cst_15 [2] : vector<2x32x16xf32> to vector<2x32xf32>
    %27 = vector.shape_cast %26 : vector<2x32xf32> to vector<2x32x1xf32>
    %28 = arith.truncf %25 : vector<2x32x16xf32> to vector<2x32x16xbf16>
    "tpu.trace_start"() <{level = 10 : i32, message = "bqn,bnd->bqd"}> : () -> ()
    %cst_16 = arith.constant dense<0.000000e+00> : vector<2x32x128xf32>
    %29 = tpu.matmul %28, %15, %cst_16 {dimension_numbers = #tpu.dot_dimension_numbers<[2], [1], [1], [2], [0, 0, 0, 1, 1, 2], [0], [0]>} : vector<2x32x16xbf16>, vector<2x16x128xbf16>, vector<2x32x128xf32> -> vector<2x32x128xf32>
    "tpu.trace_stop"() : () -> ()
    %30 = tpu.reciprocal %27 {approx = true} : vector<2x32x1xf32> -> vector<2x32x1xf32>
    %31 = vector.broadcast %30 : vector<2x32x1xf32> to vector<2x32x128xf32>
    %32 = arith.mulf %29, %31 : vector<2x32x128xf32>
    %c0_17 = arith.constant 0 : index
    %c0_18 = arith.constant 0 : index
    %33 = vector.load %arg3[%c0_17, %c0_18] : memref<4x128xf32, #tpu.memory_space<vmem>>, vector<4x128xf32>
    %cst_19 = arith.constant 0.000000e+00 : f32
    %34 = vector.broadcast %cst_19 : f32 to vector<2x8x128xf32>
    %35 = vector.extract_strided_slice %32 {offsets = [0, 0, 0], sizes = [2, 8, 128], strides = [1, 1, 1]} : vector<2x32x128xf32> to vector<2x8x128xf32>
    %36 = vector.extract_strided_slice %33 {offsets = [0, 0], sizes = [1, 128], strides = [1, 1]} : vector<4x128xf32> to vector<1x128xf32>
    %37 = vector.shape_cast %36 : vector<1x128xf32> to vector<1x1x128xf32>
    %38 = vector.broadcast %37 : vector<1x1x128xf32> to vector<2x8x128xf32>
    %39 = arith.mulf %35, %38 : vector<2x8x128xf32>
    %40 = arith.addf %34, %39 : vector<2x8x128xf32>
    %41 = vector.extract_strided_slice %32 {offsets = [0, 8, 0], sizes = [2, 8, 128], strides = [1, 1, 1]} : vector<2x32x128xf32> to vector<2x8x128xf32>
    %42 = vector.extract_strided_slice %33 {offsets = [1, 0], sizes = [1, 128], strides = [1, 1]} : vector<4x128xf32> to vector<1x128xf32>
    %43 = vector.shape_cast %42 : vector<1x128xf32> to vector<1x1x128xf32>
    %44 = vector.broadcast %43 : vector<1x1x128xf32> to vector<2x8x128xf32>
    %45 = arith.mulf %41, %44 : vector<2x8x128xf32>
    %46 = arith.addf %40, %45 : vector<2x8x128xf32>
    %47 = vector.extract_strided_slice %32 {offsets = [0, 16, 0], sizes = [2, 8, 128], strides = [1, 1, 1]} : vector<2x32x128xf32> to vector<2x8x128xf32>
    %48 = vector.extract_strided_slice %33 {offsets = [2, 0], sizes = [1, 128], strides = [1, 1]} : vector<4x128xf32> to vector<1x128xf32>
    %49 = vector.shape_cast %48 : vector<1x128xf32> to vector<1x1x128xf32>
    %50 = vector.broadcast %49 : vector<1x1x128xf32> to vector<2x8x128xf32>
    %51 = arith.mulf %47, %50 : vector<2x8x128xf32>
    %52 = arith.addf %46, %51 : vector<2x8x128xf32>
    %53 = vector.extract_strided_slice %32 {offsets = [0, 24, 0], sizes = [2, 8, 128], strides = [1, 1, 1]} : vector<2x32x128xf32> to vector<2x8x128xf32>
    %54 = vector.extract_strided_slice %33 {offsets = [3, 0], sizes = [1, 128], strides = [1, 1]} : vector<4x128xf32> to vector<1x128xf32>
    %55 = vector.shape_cast %54 : vector<1x128xf32> to vector<1x1x128xf32>
    %56 = vector.broadcast %55 : vector<1x1x128xf32> to vector<2x8x128xf32>
    %57 = arith.mulf %53, %56 : vector<2x8x128xf32>
    %58 = arith.addf %52, %57 : vector<2x8x128xf32>
    %c0_20 = arith.constant 0 : index
    %c0_21 = arith.constant 0 : index
    %59 = vector.load %arg1[%c0_20, %c0_21] : memref<8x128xf32, #tpu.memory_space<vmem>>, vector<8x128xf32>
    %60 = vector.shape_cast %59 : vector<8x128xf32> to vector<1x8x128xf32>
    %61 = vector.broadcast %60 : vector<1x8x128xf32> to vector<2x8x128xf32>
    %62 = arith.addf %61, %58 : vector<2x8x128xf32>
    %63 = vector.shape_cast %62 : vector<2x8x128xf32> to vector<16x128xf32>
    %64 = arith.truncf %63 : vector<16x128xf32> to vector<16x128xbf16>
    %c0_22 = arith.constant 0 : index
    %c0_23 = arith.constant 0 : index
    %65 = vector.load %arg8[%c0_22, %c0_23] : memref<128x128xbf16, #tpu.memory_space<vmem>>, vector<128x128xbf16>
    %cst_24 = arith.constant dense<0.000000e+00> : vector<16x128xf32>
    %66 = tpu.matmul %64, %65, %cst_24 {dimension_numbers = #tpu.dot_dimension_numbers<[1], [0], [0], [1], [0, 0, 1, 1], [], []>} : vector<16x128xbf16>, vector<128x128xbf16>, vector<16x128xf32> -> vector<16x128xf32>
    %c0_25 = arith.constant 0 : index
    %c0_26 = arith.constant 0 : index
    %67 = vector.load %arg9[%c0_25, %c0_26] : memref<1x128xf32, #tpu.memory_space<vmem>>, vector<1x128xf32>
    %68 = vector.broadcast %67 : vector<1x128xf32> to vector<16x128xf32>
    %69 = arith.addf %66, %68 : vector<16x128xf32>
    %cst_27 = arith.constant 0.000000e+00 : f32
    %70 = vector.broadcast %cst_27 : f32 to vector<16x128xf32>
    %71 = arith.maximumf %69, %70 : vector<16x128xf32>
    %72 = arith.addf %63, %71 : vector<16x128xf32>
    %73 = vector.shape_cast %72 : vector<16x128xf32> to vector<2x8x128xf32>
    %c0_28 = arith.constant 0 : index
    %c0_29 = arith.constant 0 : index
    %c0_30 = arith.constant 0 : index
    %74 = vector.load %arg11[%c0_28, %c0_29, %c0_30] : memref<2x8x128xf32, #tpu.memory_space<vmem>>, vector<2x8x128xf32>
    tpu.vector_store %arg11[%c0_28, %c0_29, %c0_30], %73 {strides = array<i32>} : memref<2x8x128xf32, #tpu.memory_space<vmem>>, vector<2x8x128xf32>,
    return
  }
  func.func @transform_0(%arg0: i32) -> (i32, i32) {
    %c0_i32 = arith.constant 0 : i32
    %c0_i32_0 = arith.constant 0 : i32
    %c0_i32_1 = arith.constant 0 : i32
    return %c0_i32, %c0_i32_0 : i32, i32
  }
  func.func @transform_1(%arg0: i32) -> (i32, i32) {
    %c0_i32 = arith.constant 0 : i32
    %c0_i32_0 = arith.constant 0 : i32
    %c0_i32_1 = arith.constant 0 : i32
    return %c0_i32, %c0_i32_0 : i32, i32
  }
  func.func @transform_2(%arg0: i32) -> (i32, i32) {
    %c0_i32 = arith.constant 0 : i32
    %c0_i32_0 = arith.constant 0 : i32
    %c0_i32_1 = arith.constant 0 : i32
    return %c0_i32, %c0_i32_0 : i32, i32
  }
  func.func @transform_3(%arg0: i32) -> (i32, i32) {
    %c0_i32 = arith.constant 0 : i32
    %c0_i32_0 = arith.constant 0 : i32
    %c0_i32_1 = arith.constant 0 : i32
    return %c0_i32, %c0_i32_0 : i32, i32
  }
  func.func @transform_4(%arg0: i32) -> (i32, i32) {
    %c0_i32 = arith.constant 0 : i32
    %c0_i32_0 = arith.constant 0 : i32
    %c0_i32_1 = arith.constant 0 : i32
    return %c0_i32, %c0_i32_0 : i32, i32
  }
  func.func @transform_5(%arg0: i32) -> (i32, i32) {
    %c0_i32 = arith.constant 0 : i32
    %c0_i32_0 = arith.constant 0 : i32
    %c0_i32_1 = arith.constant 0 : i32
    return %c0_i32, %c0_i32_0 : i32, i32
  }
  func.func @transform_6(%arg0: i32) -> (i32, i32) {
    %c0_i32 = arith.constant 0 : i32
    %c0_i32_0 = arith.constant 0 : i32
    %c0_i32_1 = arith.constant 0 : i32
    return %c0_i32, %c0_i32_0 : i32, i32
  }
  func.func @transform_7(%arg0: i32) -> (i32, i32) {
    %c0_i32 = arith.constant 0 : i32
    %c0_i32_0 = arith.constant 0 : i32
    %c0_i32_1 = arith.constant 0 : i32
    return %c0_i32, %c0_i32_0 : i32, i32
  }
  func.func @transform_8(%arg0: i32) -> (i32, i32) {
    %c0_i32 = arith.constant 0 : i32
    %c0_i32_0 = arith.constant 0 : i32
    %c0_i32_1 = arith.constant 0 : i32
    return %c0_i32, %c0_i32_0 : i32, i32
  }
  func.func @transform_9(%arg0: i32) -> (i32, i32, i32) {
    %c0_i32 = arith.constant 0 : i32
    %c0_i32_0 = arith.constant 0 : i32
    %c0_i32_1 = arith.constant 0 : i32
    return %arg0, %c0_i32, %c0_i32_0 : i32, i32, i32
  }
  func.func @transform_10(%arg0: i32) -> (i32, i32, i32) {
    %c0_i32 = arith.constant 0 : i32
    %c0_i32_0 = arith.constant 0 : i32
    %c0_i32_1 = arith.constant 0 : i32
    return %arg0, %c0_i32, %c0_i32_0 : i32, i32, i32
  }
}

</mosaic_0001>

<bundles_post_ra>
// kernel: tpu_custom_call.1
= control target key start
LH: loop header
LB: loop body
LE: loop exit
PB: predicated region body
PF: predicated region fallthrough
CT: control target
= control target key end

     0   :  { %s2110_s0 = inlined_call_operand.hbm [shape: f32[8,128], index: 0, kind: input, shape index: {}]   ;;  %s2111_s1 = inlined_call_operand.hbm [shape: bf16[32,128], index: 1, kind: input, shape index: {}]   ;;  %s2112_s2 = inlined_call_operand.hbm [shape: f32[4,128], index: 2, kind: input, shape index: {}]   ;;  %s2113_s3 = inlined_call_operand.hbm [shape: bf16[128,128], index: 3, kind: input, shape index: {}]   ;;  %s2114_s4 = inlined_call_operand.vmem [shape: f32[1,128], index: 4, kind: input, shape index: {}]   ;;  %s2115_s5 = inlined_call_operand.hbm [shape: bf16[128,128], index: 5, kind: input, shape index: {}]   ;;  %s2116_s6 = inlined_call_operand.vmem [shape: f32[1,128], index: 6, kind: input, shape index: {}]   ;;  %s2117_s7 = inlined_call_operand.hbm [shape: bf16[128,128], index: 7, kind: input, shape index: {}]   ;;  %s2118_s8 = inlined_call_operand.vmem [shape: f32[1,128], index: 8, kind: input, shape index: {}]   ;;  %s2119_s9 = inlined_call_operand.hbm [shape: bf16[4,16,128], index: 9, kind: input, shape index: {}]   ;;  %s2120_s10 = inlined_call_operand.hbm [shape: f32[4,8,128], index: 10, kind: output, shape index: {}]  }
   0x1   :  { %2123 = sst [smem:[#allocation21_spill]] %s2110_s0 }
   0x2   :  { %2124 = sst [smem:[#allocation22_spill]] %s2111_s1 }
   0x3   :  { %2125 = sst [smem:[#allocation23_spill]] %s2112_s2 }
   0x4   :  { %2126 = sst [smem:[#allocation24_spill]] %s2113_s3 }
   0x5   :  { %2127 = sst [smem:[#allocation25_spill]] %s2115_s5 }
   0x6   :  { %15 = vsyncpa [#allocation3], 0 }
   0x7   :  { %16 = vsyncpa [#allocation6], 0 }
   0x8   :  { %17 = vsyncpa [#allocation9], 0 }
   0x9   :  { %18 = vsyncpa [#allocation12], 0 }
   0xa   :  { %19 = vsyncpa [#allocation4], 0 }
   0xb   :  { %21 = vsyncpa [#allocation4 + $0x1], 0  ;;  %s1858_s13 = smov 0   ;;  %s1860_s14 = smov 0  }
   0xc   :  { %s1862_s15 = smov 0   ;;  %s1864_s16 = smov 0  }
   0xd LB: > { %s2128_s0 = sld [smem:[#allocation21_spill]]  ;;  %s1882_s20 = sadd.s32 4294967295, %s1791_s16   ;;  %s1791_s16 = sphi %s1864_s16, %s2146_s16   ;;  %s1787_s15 = sphi %s1862_s15, %s2145_s15   ;;  %s1783_s14 = sphi %s1860_s14, %s2144_s14   ;;  %s1779_s13 = sphi %s1858_s13, %s2143_s13  }
   0xe   : > { %p1180_p0 = scmp.ge.s32.totalorder %s1791_s16, 1  ;;  %p237_p1 = scmp.eq.s32.totalorder %s1882_s20, 0 }
   0xf   : > { %p273_p2 = scmp.lt.s32.totalorder %s1791_s16, 3  ;;  %s1793_s22 = smov [#allocation2]  }
  0x10   : > { %s287_s23 = sshll.u32 %s1793_s22, 4  ;;  %s2130_s1 = sld [smem:[#allocation22_spill]]  ;;  %s288_s23 = int_to_ptr.vmem [resolvable:$true] %s287_s23 }
  0x11   : > { %p1887_p3 = pnand %p1180_p0, %p273_p2  ;;  %s1794_s28 = smov [#allocation5]  }
  0x12   : > { %s298_s29 = sshll.u32 %s1794_s28, 4  ;;  %s2121_s30 = smov 64   ;;  %s299_s29 = int_to_ptr.vmem [resolvable:$true] %s298_s29 }
  0x13   : > { %s285_s19 = sshll.u32 %s2128_s0, 4  ;;  %p1381_p5 = pneg %p1887_p3  ;;  %s286_s19 = int_to_ptr.hbm [resolvable:$true] %s285_s19 }
  0x14   : > { %s2122_s11 = smov 4   ;;  %s2132_s3 = sld [smem:[#allocation24_spill]] }
  0x15   : > { %p1899_p6 = pnand %p1381_p5, %p237_p1  ;;  %s1797_s22 = smov [#allocation8]  }
  0x16   : > { %s296_s26 = sshll.u32 %s2130_s1, 4  ;;  %s324_s24 = sshll.u32 %s1797_s22, 4  ;;  %s297_s26 = int_to_ptr.hbm [resolvable:$true] %s296_s26  ;;  %s325_s24 = int_to_ptr.vmem [resolvable:$true] %s324_s24 }
  0x17   : > { %1384 = dma.hbm_to_vmem [thread:$0]  (!%p1899_p6), %s286_s19, 128, %s288_s23, [#allocation3]  }
  0x18   : > { %1387 = dma.hbm_to_vmem [thread:$0]  (!%p1899_p6), %s297_s26, 256, %s299_s29, [#allocation6], %s2121_s30, %s2121_s30, %s2122_s11  }
  0x19   : > { %s2133_s2 = sld [smem:[#allocation23_spill]]  ;;  %s1798_s23 = smov [#allocation7]  }
  0x1a   : > { %s322_s18 = sshll.u32 %s2132_s3, 4  ;;  %s313_s26 = sshll.u32 %s1798_s23, 4  ;;  %s323_s18 = int_to_ptr.hbm [resolvable:$true] %s322_s18  ;;  %s314_s26 = int_to_ptr.vmem [resolvable:$true] %s313_s26 }
  0x1b   : > { %1393 = dma.hbm_to_vmem [thread:$0]  (!%p1899_p6), %s323_s18, 1024, %s325_s24, [#allocation9], %s2121_s30, %s2121_s30, %s2122_s11  }
  0x1c   : > { %s2134_s5 = sld [smem:[#allocation25_spill]]  ;;  %s356_s18 = sshll.u32 %s2117_s7, 4  ;;  %s357_s18 = int_to_ptr.hbm [resolvable:$true] %s356_s18 }
  0x1d   : > { %s1799_s24 = smov [#allocation10]   ;;  %s1941_s29 = sadd.s32 1, %s1791_s16  }
  0x1e   : > { %s341_s28 = sshll.u32 %s1799_s24, 4  ;;  %s220_s12 = ssub.s32 %s1791_s16, %s1941_s29  ;;  %s342_s28 = int_to_ptr.vmem [resolvable:$true] %s341_s28 }
  0x1f   : > { %s311_s19 = sshll.u32 %s2133_s2, 4  ;;  %s223_s22 = sadd.s32 1, %s1787_s15  ;;  %s312_s19 = int_to_ptr.hbm [resolvable:$true] %s311_s19 }
  0x20   : > { %1390 = dma.hbm_to_vmem [thread:$0]  (!%p1899_p6), %s312_s19, 64, %s314_s26, [#allocation6]  }
  0x21   : > { %s1800_s19 = smov [#allocation11]   ;;  %s1179_s26 = sadd.s32 4294967294, %s1791_s16  }
  0x22   : > { %s339_s17 = sshll.u32 %s2134_s5, 4  ;;  %s358_s23 = sshll.u32 %s1800_s19, 4  ;;  %s340_s17 = int_to_ptr.hbm [resolvable:$true] %s339_s17  ;;  %s359_s23 = int_to_ptr.vmem [resolvable:$true] %s358_s23 }
  0x23   : > { %1396 = dma.hbm_to_vmem [thread:$0]  (!%p1899_p6), %s340_s17, 1024, %s342_s28, [#allocation9], %s2121_s30, %s2121_s30, %s2122_s11  }
  0x24   : > { %1399 = dma.hbm_to_vmem [thread:$0]  (!%p1899_p6), %s357_s18, 1024, %s359_s23, [#allocation12], %s2121_s30, %s2121_s30, %s2122_s11  }
  0x25   : > { %p221_p7 = scmp.eq.s32.totalorder %s220_s12, 0  ;;  %p230_p8 = scmp.ne.s32.totalorder %s1787_s15, %s1783_s14 }
  0x26   : > { %p231_p9 = scmp.eq.s32.totalorder %s1791_s16, 0  ;;  %p236_p10 = scmp.ne.s32.totalorder %s1783_s14, %s1779_s13 }
  0x27   : > { %s1952_s17 = scalar_select %p221_p7, %s1787_s15, %s223_s22  }
  0x28   : > { %p1956_p11 = por %p237_p1, %p236_p10  ;;  %p260_p12 = scmp.eq.s32.totalorder %s1882_s20, 1 }
  0x29   : > { %p266_p13 = scmp.eq.s32.totalorder %s1179_s26, 1  ;;  %p1961_p0 = por %p231_p9, %p230_p8 }
  0x2a   : > { %p1414_p2 = scmp.lt.s32.totalorder %s1791_s16, 2  ;;  %p1966_p5 = por %p260_p12, %p230_p8 }
  0x2b   : > { %p1970_p6 = por %p266_p13, %p236_p10  ;;  %s375_s28 = sand.u32 1, %s1791_s16  }
  0x2c   : > { %s377_s19 = sand.u32 1, %s1787_s15   ;;  %s1323_s12 = sshll.u32 %s1791_s16, 4 }
  0x2d   : > { %s1188_s23 = sshll.u32 %s377_s19, 4  ;;  %s385_s30 = scalar_lea.hbm %s2119_s9, %s1323_s12 }
  0x2e   : > { %s386_s11 = sshll.u32 %s385_s30, 4  ;;  %s379_s0 = scalar_lea.vmem [#allocation13], %s1188_s23  ;;  %s387_s11 = int_to_ptr.hbm [resolvable:$true] %s386_s11 }
  0x2f   : > { %s388_s1 = sshll.u32 %s379_s0, 4  ;;  %p1984_p7 = pnand %p1414_p2, %p1961_p0  ;;  %s389_s1 = int_to_ptr.vmem [resolvable:$true] %s388_s1 }
  0x30   : > { %s376_s3 = scalar_lea.sflag [#allocation3], %s375_s28  ;;  %s1679_s5 = sshra.s32 %s387_s11, 4  ;;  %s1680_s5 = int_to_ptr.hbm [resolvable:$true] %s1679_s5 }
  0x31   : > { %s1681_s19 = scalar_lea.hbm %s1680_s5, 16  ;;  %p1683_p9 = pneg %p1984_p7 }
  0x32   : > { %p1682_p8 = scmp.ne.s32.totalorder %s1680_s5, %s1681_s19  ;;  %s1686_s23 = scalar_lea.hbm %s2119_s9, 32 }
  0x33   : > { %p1687_p13 = scmp.lt.s32.totalorder %s1680_s5, %s2119_s9  ;;  %p1688_p0 = scmp.lt.s32.totalorder %s1686_s23, %s1681_s19 }
  0x34   : > { %p1684_p10 = pnand %p1683_p9, %p1682_p8 }
  0x35   : > { %p1689_p2 = por %p1688_p0, %p1687_p13 }
  0x36   : > { %p1685_p12 = pneg %p1684_p10 }
  0x38   : > { %p1690_p4 = pnand %p1689_p2, %p1685_p12 }
  0x3a   : > { %1693 = shalt.err (!%p1690_p4)
}
  0x3b   : > { %s2140_s28 = smov 4   ;;  %s2141_s22 = smov 64  }
  0x3c   : > { %1403 = dma.hbm_to_vmem [thread:$0]  (!%p1984_p7), %s387_s11, 256, %s389_s1, %s376_s3, %s2141_s22, %s2141_s22, %s2140_s28  }
  0x3d   : > { %400 = sbr.rel (%p1887_p3) target bundleno = 896 (0x380), region = 60 }
  0x42   : > { %1754 = dma.done.wait (%p237_p1), [#allocation3], 128  }
  0x43   : > { %1756 = vsyncadd (%p237_p1), [#allocation3], 4294967168 }
  0x44   : > { %1758 = dma.done.wait (%p237_p1), [#allocation6], 320  }
  0x45   : > { %1760 = vsyncadd (%p237_p1), [#allocation6], 4294966976 }
  0x46   : > { %1762 = dma.done.wait (%p237_p1), [#allocation9], 2048  }
  0x47   : > { %1764 = vsyncadd (%p237_p1), [#allocation9], 4294965248 }
  0x48   : > { %1766 = dma.done.wait (%p237_p1), [#allocation12], 1024  }
  0x49   : > { %1768 = vsyncadd (%p237_p1), [#allocation12], 4294966272  ;;  %s432_s1 = sand.u32 1, %s1882_s20   ;;  %s434_s2 = sand.u32 1, %s1783_s14  }
  0x4a   : > { %s2023_s3 = sshll.u32 %s434_s2, 4  ;;  %s433_s5 = scalar_lea.sflag [#allocation3], %s432_s1 }
  0x4b   : > { %s436_s21 = scalar_lea.vmem [#allocation13], %s2023_s3 }
  0x4c   : > { %1770 = dma.done.wait (%p1956_p11), %s433_s5, 256  }
  0x4d   : > { %1772 = vsyncadd (%p1956_p11), %s433_s5, 4294967040  ;;  %v1333_v0 = vld [vmem:[#allocation8 + $0x38] sm:$0xff]  ;;  %v1332_v1 = vld [vmem:[#allocation8 + $0x30] sm:$0xff]  ;;  %vm741_vm0 = vcmask 130048   ;;  %s1352_s23 = sshll.u32 %s1882_s20, 4  ;;  %s473_s22 = scalar_lea.vmem [#allocation14], %s2023_s3 }
  0x4e   : > { %561 = vmatpush.bf16.xpose.msra.mxu0 %v1333_v0  ;;  %v1331_v2 = vld [vmem:[#allocation8 + $0x28] sm:$0xff]  ;;  %v1330_v3 = vld [vmem:[#allocation8 + $0x20] sm:$0xff]  ;;  %v1329_v4 = vld [vmem:[#allocation8 + $0x18] sm:$0xff]  ;;  %s1045_s28 = scalar_lea.hbm %s2120_s10, %s1352_s23  ;;  %s1046_s1 = sshll.u32 %s473_s22, 4  ;;  %s1047_s1 = int_to_ptr.vmem [resolvable:$true] %s1046_s1 }
  0x4f   : > { %v1328_v5 = vld [vmem:[#allocation8 + $0x10] sm:$0xff]  ;;  %v1327_v6 = vld [vmem:[#allocation8 + $0x8] sm:$0xff]  ;;  %v1326_v7 = vld [vmem:[#allocation8] sm:$0xff]  ;;  %s1048_s5 = sshll.u32 %s1045_s28, 4  ;;  %s1729_s26 = scalar_lea.hbm %s2120_s10, 32  ;;  %s1049_s5 = int_to_ptr.hbm [resolvable:$true] %s1048_s5 }
  0x50   : > { %v1324_v8 = vld [vmem:[%s436_s21] sm:$0xff]  ;;  %v1325_v9 = vld [vmem:[%s436_s21 + $0x8] sm:$0xff]  ;;  %s1034_s21 = scalar_lea.sflag [#allocation4], %s434_s2  ;;  %s1723_s20 = sshra.s32 %s1049_s5, 4  ;;  %s1724_s20 = int_to_ptr.hbm [resolvable:$true] %s1723_s20 }
  0x51   : > { %v1464_v11 = vld [vmem:[%s2114_s4] ss:$0 sm:$0xff]  ;;  %v1341_v14 = vld [vmem:[#allocation10 + $0x38] sm:$0xff]  ;;  %v1342_v22 = vld [vmem:[#allocation5] sm:$0xff]  ;;  %s1725_s11 = scalar_lea.hbm %s1724_s20, 16  ;;  %p1730_p11 = scmp.lt.s32.totalorder %s1724_s20, %s2120_s10 }
  0x52   : > { %648 = vmatpush.bf16.xpose.msra.mxu1 %v1341_v14  ;;  %v1340_v25 = vld [vmem:[#allocation10 + $0x30] sm:$0xff]  ;;  %v1339_v31 = vld [vmem:[#allocation10 + $0x28] sm:$0xff]  ;;  %v1338_v34 = vld [vmem:[#allocation10 + $0x20] sm:$0xff]  ;;  %p1726_p1 = scmp.ne.s32.totalorder %s1724_s20, %s1725_s11  ;;  %p1731_p7 = scmp.lt.s32.totalorder %s1729_s26, %s1725_s11 }
  0x53   : > { %v1343_v33 = vld [vmem:[#allocation5 + $0x8] sm:$0xff]  ;;  %v1335_v37 = vld [vmem:[#allocation10 + $0x8] sm:$0xff]  ;;  %v1334_v38 = vld [vmem:[#allocation10] sm:$0xff] }
  0x54   : > { %v1337_v35 = vld [vmem:[#allocation10 + $0x18] sm:$0xff]  ;;  %v1336_v36 = vld [vmem:[#allocation10 + $0x10] sm:$0xff]  ;;  %v1465_v55 = vld [vmem:[%s2116_s6] ss:$0 sm:$0xff]  ;;  %p1727_p3 = pnand %p1726_p1, %p1966_p5  ;;  %p1732_p8 = por %p1731_p7, %p1730_p11 }
  0x56   : > { %562 = vmatpush.bf16.xpose.msra.mxu0 %v1332_v1  ;;  %p1728_p4 = pneg %p1727_p3 }
  0x58   : > { %p1733_p9 = pnand %p1732_p8, %p1728_p4 }
  0x5a   : > { %649 = vmatpush.bf16.xpose.msra.mxu1 %v1340_v25 }
  0x5e   : > { %563 = vmatpush.bf16.xpose.msra.mxu0 %v1331_v2 }
  0x62   : > { %650 = vmatpush.bf16.xpose.msra.mxu1 %v1339_v31 }
  0x66   : > { %564 = vmatpush.bf16.xpose.msra.mxu0 %v1330_v3 }
  0x6a   : > { %651 = vmatpush.bf16.xpose.msra.mxu1 %v1338_v34 }
  0x6e   : > { %565 = vmatpush.bf16.xpose.msra.mxu0 %v1329_v4 }
  0x72   : > { %652 = vmatpush.bf16.xpose.msra.mxu1 %v1337_v35 }
  0x76   : > { %566 = vmatpush.bf16.xpose.msra.mxu0 %v1328_v5 }
  0x7a   : > { %653 = vmatpush.bf16.xpose.msra.mxu1 %v1336_v36 }
  0x7e   : > { %567 = vmatpush.bf16.xpose.msra.mxu0 %v1327_v6 }
  0x82   : > { %654 = vmatpush.bf16.xpose.msra.mxu1 %v1335_v37 }
  0x86   : > { %568 = vmatpush.bf16.xpose.msra.mxu0 %v1326_v7 }
  0x8a   : > { %655 = vmatpush.bf16.xpose.msra.mxu1 %v1334_v38 }
  0x8d   : > { %569 = vmatmul.bf16.vlgmr.msra.gmra.mxu0 %v1324_v8 }
  0x91   : > { %656 = vmatmul.bf16.vlgmr.msra.gmra.mxu1 %v1324_v8 }
  0x9d   : > { %574 = vmatmul.bf16.gmra.mxu0 %v1325_v9 }
  0xa1   : > { %661 = vmatmul.bf16.gmra.mxu1 %v1325_v9 }
 0x10a   : > { %v570_v10 = vpop.f32.mrf.mxu0 }
 0x10b   : > { %v571_v12 = vadd.f32 %v1464_v11, %v570_v10 }
 0x10d   : > { %v667_v15 = vpack.c.bf16 %v571_v12, %v571_v12 }
 0x10e   : > { %v657_v56 = vpop.f32.mrf.mxu1 }
 0x10f   : > { %v693_v18 = vunpack.c.l.b16 %v667_v15  ;;  %v658_v57 = vadd.f32 %v1465_v55, %v657_v56 }
 0x111   : > { %v671_v58 = vpack.c.bf16 %v658_v57, %v658_v57 }
 0x112   : > { %v572_v13 = vpop.f32.mrf.mxu0 }
 0x113   : > { %v573_v16 = vadd.f32 %v1464_v11, %v572_v13  ;;  %v834_v61 = vunpack.c.l.b16 %v671_v58 }
 0x115   : > { %v668_v17 = vpack.c.bf16 %v573_v16, %v573_v16 }
 0x116   : > { %v659_v59 = vpop.f32.mrf.mxu1 }
 0x117   : > { %v694_v19 = vunpack.c.l.b16 %v668_v17  ;;  %v660_v60 = vadd.f32 %v1465_v55, %v659_v59 }
 0x119   : > { %v695_v20 = vpack.c.b16 %v694_v19, %v693_v18  ;;  %v672_v62 = vpack.c.bf16 %v660_v60, %v660_v60 }
 0x11a   : > { %v575_v21 = vpop.f32.mrf.mxu0 }
 0x11b   : > { %704 = vmatpush.bf16.xpose.msra.mxu2 %v695_v20  ;;  %v576_v23 = vadd.f32 %v1464_v11, %v575_v21  ;;  %v835_v63 = vunpack.c.l.b16 %v672_v62 }
 0x11d   : > { %v669_v26 = vpack.c.bf16 %v576_v23, %v576_v23  ;;  %v836_v0 = vpack.c.b16 %v835_v63, %v834_v61 }
 0x11e   : > { %v662_v1 = vpop.f32.mrf.mxu1 }
 0x11f   : > { %v718_v29 = vunpack.c.l.b16 %v669_v26  ;;  %v663_v3 = vadd.f32 %v1465_v55, %v662_v1 }
 0x121   : > { %v673_v5 = vpack.c.bf16 %v663_v3, %v663_v3 }
 0x122   : > { %v577_v24 = vpop.f32.mrf.mxu0  ;;  %705 = vmatmul.bf16.vlgmr.msra.gmra.mxu2 %v1342_v22 }
 0x123   : > { %v578_v27 = vadd.f32 %v1464_v11, %v577_v24  ;;  %851 = vmatpush.bf16.msrb.mxu2 %v836_v0  ;;  %v875_v7 = vunpack.c.l.b16 %v673_v5 }
 0x125   : > { %v670_v28 = vpack.c.bf16 %v578_v27, %v578_v27 }
 0x126   : > { %v664_v2 = vpop.f32.mrf.mxu1 }
 0x127   : > { %v719_v30 = vunpack.c.l.b16 %v670_v28  ;;  %v665_v4 = vadd.f32 %v1465_v55, %v664_v2 }
 0x129   : > { %v720_v32 = vpack.c.b16 %v719_v30, %v718_v29  ;;  %v674_v6 = vpack.c.bf16 %v665_v4, %v665_v4 }
 0x12b   : > { %729 = vmatpush.bf16.xpose.msra.mxu3 %v720_v32  ;;  %v876_v8 = vunpack.c.l.b16 %v674_v6  ;;  %v1351_v6 = vld [vmem:[#allocation11 + $0x38] sm:$0xff] }
 0x12c   : > { %1013 = vmatpush.bf16.msra.mxu2 %v1351_v6 }
 0x12d   : > { %v877_v9 = vpack.c.b16 %v876_v8, %v875_v7  ;;  %v1350_v7 = vld [vmem:[#allocation11 + $0x30] sm:$0xff]  ;;  %v1349_v8 = vld [vmem:[#allocation11 + $0x28] sm:$0xff] }
 0x130   : > { %1014 = vmatpush.bf16.msra.mxu2 %v1350_v7 }
 0x132   : > { %710 = vmatmul.bf16.gmra.mxu2 %v1343_v33  ;;  %730 = vmatmul.bf16.vlgmr.msra.gmra.mxu3 %v1342_v22 }
 0x133   : > { %892 = vmatpush.bf16.msrb.mxu3 %v877_v9  ;;  %v1348_v9 = vld [vmem:[#allocation11 + $0x20] sm:$0xff] }
 0x134   : > { %1015 = vmatpush.bf16.msra.mxu2 %v1349_v8 }
 0x138   : > { %1016 = vmatpush.bf16.msra.mxu2 %v1348_v9 }
 0x142   : > { %735 = vmatmul.bf16.gmra.mxu3 %v1343_v33 }
 0x1a5   : > { %v706_v39 = vpop.f32.mrf.mxu2 }
 0x1a6   : > { %v742_v40 = vsel %vm741_vm0, %v706_v39, -inf }
 0x1a7   : > { %743 = vmax.xlane.f32.xlu0 %v742_v40 }
 0x1ad   : > { %v708_v41 = vpop.f32.mrf.mxu2 }
 0x1ae   : > { %v745_v42 = vsel %vm741_vm0, %v708_v41, -inf }
 0x1af   : > { %746 = vmax.xlane.f32.xlu0 %v745_v42 }
 0x1b5   : > { %v711_v43 = vpop.f32.mrf.mxu2  ;;  %v731_v44 = vpop.f32.mrf.mxu3 }
 0x1b6   : > { %v754_v45 = vsel %vm741_vm0, %v731_v44, -inf  ;;  %v748_v46 = vsel %vm741_vm0, %v711_v43, -inf }
 0x1b7   : > { %755 = vmax.xlane.f32.xlu1 %v754_v45  ;;  %749 = vmax.xlane.f32.xlu2 %v748_v46 }
 0x1bd   : > { %v2037_v47 = vpop.f32.mrf.mxu2  ;;  %v2039_v48 = vpop.f32.mrf.mxu3 }
 0x1be   : > { %v757_v49 = vsel %vm741_vm0, %v2039_v48, -inf  ;;  %v751_v50 = vsel %vm741_vm0, %v2037_v47, -inf }
 0x1bf   : > { %758 = vmax.xlane.f32.xlu1 %v757_v49  ;;  %752 = vmax.xlane.f32.xlu2 %v751_v50 }
 0x1c5   : > { %v2045_v51 = vpop.f32.mrf.mxu3 }
 0x1c6   : > { %v760_v52 = vsel %vm741_vm0, %v2045_v51, -inf }
 0x1c7   : > { %761 = vmax.xlane.f32.xlu0 %v760_v52 }
 0x1cd   : > { %v2049_v53 = vpop.f32.mrf.mxu3 }
 0x1ce   : > { %v763_v54 = vsel %vm741_vm0, %v2049_v53, -inf }
 0x1cf   : > { %764 = vmax.xlane.f32.xlu1 %v763_v54 }
 0x21a   : > { %v744_v10 = vpop.xlane.xlu0 %743 }
 0x21b   : > { %v766_v11 = vsub.f32 %v706_v39, %v744_v10 }
 0x21d   : > { %v774_v12 = vmul.f32 1.442695, %v766_v11  ;;  %v1347_v11 = vld [vmem:[#allocation11 + $0x18] sm:$0xff] }
 0x21e   : > { %1017 = vmatpush.bf16.msra.mxu2 %v1347_v11 }
 0x21f   : > { %1467 = vpow2.f32 %v774_v12  ;;  %v1346_v12 = vld [vmem:[#allocation11 + $0x10] sm:$0xff] }
 0x222   : > { %v747_v13 = vpop.xlane.xlu0 %746  ;;  %1018 = vmatpush.bf16.msra.mxu2 %v1346_v12 }
 0x223   : > { %v767_v14 = vsub.f32 %v708_v41, %v747_v13 }
 0x225   : > { %v1468_v15 = vpop.eup %1467  ;;  %v776_v16 = vmul.f32 1.442695, %v767_v14  ;;  %v1345_v14 = vld [vmem:[#allocation11 + $0x8] sm:$0xff] }
 0x226   : > { %v790_v17 = vsel %vm741_vm0, %v1468_v15, 0.0  ;;  %v814_v22 = vpack.c.bf16 %v1468_v15, %v1468_v15  ;;  %1019 = vmatpush.bf16.msra.mxu2 %v1345_v14 }
 0x227   : > { %1469 = vpow2.f32 %v776_v16  ;;  %791 = vadd.xlane.f32.xlu2 %v790_v17 }
 0x228   : > { %v826_v28 = vunpack.c.l.b16 %v814_v22 }
 0x22a   : > { %v756_v18 = vpop.xlane.xlu1 %755  ;;  %v750_v19 = vpop.xlane.xlu2 %749 }
 0x22b   : > { %v770_v20 = vsub.f32 %v731_v44, %v756_v18  ;;  %v768_v21 = vsub.f32 %v711_v43, %v750_v19  ;;  %v1344_v18 = vld [vmem:[#allocation11] sm:$0xff] }
 0x22c   : > { %1020 = vmatpush.bf16.msra.mxu2 %v1344_v18 }
 0x22d   : > { %v1470_v23 = vpop.eup %1469  ;;  %v782_v24 = vmul.f32 1.442695, %v770_v20  ;;  %v778_v25 = vmul.f32 1.442695, %v768_v21 }
 0x22e   : > { %v815_v26 = vpack.c.bf16 %v1470_v23, %v1470_v23  ;;  %v793_v27 = vsel %vm741_vm0, %v1470_v23, 0.0 }
 0x22f   : > { %1471 = vpow2.f32 %v782_v24  ;;  %794 = vadd.xlane.f32.xlu0 %v793_v27 }
 0x230   : > { %v827_v29 = vunpack.c.l.b16 %v815_v26  ;;  %1473 = vpow2.f32 %v778_v25 }
 0x232   : > { %v759_v30 = vpop.xlane.xlu1 %758  ;;  %v753_v31 = vpop.xlane.xlu2 %752  ;;  %v830_v32 = vpack.c.b16 %v827_v29, %v826_v28  ;;  %v920_v28 = vld [vmem:[#allocation7] sm:$0xf] }
 0x233   : > { %v771_v33 = vsub.f32 %v2039_v48, %v759_v30  ;;  %v769_v34 = vsub.f32 %v2037_v47, %v753_v31 }
 0x234   : > { %1281 = vmatmul.msk.bf16.vlgmr.msrb.gmra.mxu2 %vm741_vm0, %v830_v32  ;;  %v926_v32 = vperm.slane %v920_v28, 1 }
 0x235   : > { %v1472_v35 = vpop.eup %1471  ;;  %v784_v36 = vmul.f32 1.442695, %v771_v33  ;;  %v780_v37 = vmul.f32 1.442695, %v769_v34 }
 0x236   : > { %v1474_v38 = vpop.eup %1473  ;;  %v802_v39 = vsel %vm741_vm0, %v1472_v35, 0.0  ;;  %v818_v43 = vpack.c.bf16 %v1472_v35, %v1472_v35  ;;  %v921_v35 = vperm.slane %v920_v28, 0 }
 0x237   : > { %1475 = vpow2.f32 %v784_v36  ;;  %803 = vadd.xlane.f32.xlu1 %v802_v39  ;;  %v796_v40 = vsel %vm741_vm0, %v1474_v38, 0.0  ;;  %v816_v46 = vpack.c.bf16 %v1474_v38, %v1474_v38 }
 0x238   : > { %1477 = vpow2.f32 %v780_v37  ;;  %797 = vadd.xlane.f32.xlu0 %v796_v40  ;;  %v867_v52 = vunpack.c.l.b16 %v818_v43 }
 0x239   : > { %v828_v55 = vunpack.c.l.b16 %v816_v46 }
 0x23a   : > { %v762_v41 = vpop.xlane.xlu0 %761 }
 0x23b   : > { %v772_v42 = vsub.f32 %v2045_v51, %v762_v41  ;;  %v931_v41 = vperm.slane %v920_v28, 2 }
 0x23d   : > { %v1476_v44 = vpop.eup %1475  ;;  %v786_v45 = vmul.f32 1.442695, %v772_v42 }
 0x23e   : > { %v1478_v47 = vpop.eup %1477  ;;  %v819_v48 = vpack.c.bf16 %v1476_v44, %v1476_v44  ;;  %v805_v49 = vsel %vm741_vm0, %v1476_v44, 0.0  ;;  %v936_v44 = vperm.slane %v920_v28, 3 }
 0x23f   : > { %1479 = vpow2.f32 %v786_v45  ;;  %806 = vadd.xlane.f32.xlu2 %v805_v49  ;;  %v817_v50 = vpack.c.bf16 %v1478_v47, %v1478_v47  ;;  %v799_v63 = vsel %vm741_vm0, %v1478_v47, 0.0 }
 0x240   : > { %v868_v54 = vunpack.c.l.b16 %v819_v48 }
 0x241   : > { %v829_v56 = vunpack.c.l.b16 %v817_v50 }
 0x242   : > { %v765_v57 = vpop.xlane.xlu1 %764  ;;  %v871_v58 = vpack.c.b16 %v868_v54, %v867_v52 }
 0x243   : > { %v773_v59 = vsub.f32 %v2049_v53, %v765_v57  ;;  %v831_v51 = vpack.c.b16 %v829_v56, %v828_v55 }
 0x244   : > { %1283 = vmatmul.msk.bf16.vlgmr.msrb.gmra.mxu3 %vm741_vm0, %v871_v58 }
 0x245   : > { %v1480_v60 = vpop.eup %1479  ;;  %v788_v61 = vmul.f32 1.442695, %v773_v59  ;;  %1282 = vmatmul.msk.bf16.gmra.mxu2 %vm741_vm0, %v831_v51 }
 0x246   : > { %v808_v62 = vsel %vm741_vm0, %v1480_v60, 0.0  ;;  %v820_v0 = vpack.c.bf16 %v1480_v60, %v1480_v60 }
 0x247   : > { %1481 = vpow2.f32 %v788_v61  ;;  %809 = vadd.xlane.f32.xlu1 %v808_v62  ;;  %800 = vadd.xlane.f32.xlu2 %v799_v63 }
 0x248   : > { %v869_v53 = vunpack.c.l.b16 %v820_v0 }
 0x24d   : > { %v1482_v1 = vpop.eup %1481 }
 0x24e   : > { %v811_v2 = vsel %vm741_vm0, %v1482_v1, 0.0  ;;  %v821_v3 = vpack.c.bf16 %v1482_v1, %v1482_v1  ;;  %v941_v1 = vld [vmem:[#allocation2] sm:$0xff] }
 0x24f   : > { %812 = vadd.xlane.f32.xlu0 %v811_v2 }
 0x250   : > { %v870_v4 = vunpack.c.l.b16 %v821_v3 }
 0x252   : > { %v872_v5 = vpack.c.b16 %v870_v4, %v869_v53 }
 0x254   : > { %1284 = vmatmul.msk.bf16.gmra.mxu3 %vm741_vm0, %v872_v5  ;;  %v1466_v5 = vld [vmem:[%s2118_s8] ss:$0 sm:$0xff] }
 0x29a   : > { %v792_v13 = vpop.xlane.xlu2 %791 }
 0x29b   : > { %1483 = vrcp.f32 %v792_v13 }
 0x2a1   : > { %v1484_v26 = vpop.eup %1483 }
 0x2a2   : > { %v795_v15 = vpop.xlane.xlu0 %794 }
 0x2a3   : > { %1485 = vrcp.f32 %v795_v15 }
 0x2a9   : > { %v1486_v27 = vpop.eup %1485 }
 0x2aa   : > { %v804_v19 = vpop.xlane.xlu1 %803 }
 0x2ab   : > { %v798_v21 = vpop.xlane.xlu0 %797  ;;  %1487 = vrcp.f32 %v804_v19 }
 0x2ac   : > { %1489 = vrcp.f32 %v798_v21 }
 0x2b1   : > { %v1488_v29 = vpop.eup %1487 }
 0x2b2   : > { %v807_v17 = vpop.xlane.xlu2 %806  ;;  %v1490_v30 = vpop.eup %1489 }
 0x2b3   : > { %1491 = vrcp.f32 %v807_v17 }
 0x2b7   : > { %v853_v10 = vpop.f32.mrf.mxu2 }
 0x2b8   : > { %v912_v39 = vmul.f32 %v1484_v26, %v853_v10 }
 0x2b9   : > { %v1492_v34 = vpop.eup %1491 }
 0x2ba   : > { %v810_v23 = vpop.xlane.xlu1 %809  ;;  %v801_v25 = vpop.xlane.xlu2 %800  ;;  %v922_v49 = vmul.f32 %v921_v35, %v912_v39 }
 0x2bb   : > { %1493 = vrcp.f32 %v810_v23 }
 0x2bc   : > { %1495 = vrcp.f32 %v801_v25 }
 0x2bf   : > { %v855_v16 = vpop.f32.mrf.mxu2 }
 0x2c0   : > { %v913_v31 = vmul.f32 %v1486_v27, %v855_v16 }
 0x2c1   : > { %v1494_v38 = vpop.eup %1493 }
 0x2c2   : > { %v813_v33 = vpop.xlane.xlu0 %812  ;;  %v1496_v43 = vpop.eup %1495  ;;  %v927_v45 = vmul.f32 %v926_v32, %v913_v31 }
 0x2c3   : > { %1497 = vrcp.f32 %v813_v33 }
 0x2c4   : > { %v929_v54 = vadd.f32 %v927_v45, %v922_v49 }
 0x2c7   : > { %v894_v20 = vpop.f32.mrf.mxu3 }
 0x2c8   : > { %v858_v22 = vpop.f32.mrf.mxu2  ;;  %v916_v46 = vmul.f32 %v1488_v29, %v894_v20 }
 0x2c9   : > { %v914_v40 = vmul.f32 %v1490_v30, %v858_v22  ;;  %v1498_v58 = vpop.eup %1497 }
 0x2ca   : > { %v923_v55 = vmul.f32 %v921_v35, %v916_v46 }
 0x2cb   : > { %v932_v50 = vmul.f32 %v931_v41, %v914_v40 }
 0x2cd   : > { %v934_v51 = vadd.f32 %v932_v50, %v929_v54 }
 0x2cf   : > { %v896_v24 = vpop.f32.mrf.mxu3 }
 0x2d0   : > { %v860_v36 = vpop.f32.mrf.mxu2  ;;  %v917_v42 = vmul.f32 %v1492_v34, %v896_v24 }
 0x2d1   : > { %v915_v47 = vmul.f32 %v1496_v43, %v860_v36 }
 0x2d2   : > { %v928_v52 = vmul.f32 %v926_v32, %v917_v42 }
 0x2d3   : > { %v937_v56 = vmul.f32 %v936_v44, %v915_v47 }
 0x2d4   : > { %v930_v60 = vadd.f32 %v928_v52, %v923_v55 }
 0x2d5   : > { %v939_v62 = vadd.f32 %v937_v56, %v934_v51 }
 0x2d7   : > { %v899_v37 = vpop.f32.mrf.mxu3  ;;  %v942_v3 = vadd.f32 %v941_v1, %v939_v62 }
 0x2d8   : > { %v918_v48 = vmul.f32 %v1494_v38, %v899_v37 }
 0x2da   : > { %v933_v57 = vmul.f32 %v931_v41, %v918_v48 }
 0x2dc   : > { %v935_v63 = vadd.f32 %v933_v57, %v930_v60 }
 0x2df   : > { %v901_v59 = vpop.f32.mrf.mxu3 }
 0x2e0   : > { %v919_v61 = vmul.f32 %v1498_v58, %v901_v59 }
 0x2e2   : > { %v938_v0 = vmul.f32 %v936_v44, %v919_v61 }
 0x2e4   : > { %v940_v2 = vadd.f32 %v938_v0, %v935_v63 }
 0x2e6   : > { %v943_v53 = vadd.f32 %v941_v1, %v940_v2 }
 0x2e8   : > { %v944_v4 = vpack.c.bf16 %v943_v53, %v942_v3 }
 0x2ea   : > { %1021 = vmatmul.bf16.vlgmr.msra.gmra.mxu2 %v944_v4 }
 0x36d   : > { %v1022_v6 = vpop.f32.mrf.mxu2 }
 0x36e   : > { %v1023_v7 = vadd.f32 %v1466_v5, %v1022_v6 }
 0x370   : > { %v1027_v8 = vmax.f32 %v1023_v7, 0.0 }
 0x372   : > { %v1029_v9 = vadd.f32 %v1027_v8, %v942_v3 }
 0x374   : > { %1031 = vst [vmem:[%s473_s22] sm:$0xff] %v1029_v9 }
 0x375   : > { %v1024_v10 = vpop.f32.mrf.mxu2 }
 0x376   : > { %v1025_v11 = vadd.f32 %v1466_v5, %v1024_v10 }
 0x378   : > { %v1028_v12 = vmax.f32 %v1025_v11, 0.0 }
 0x37a   : > { %v1030_v13 = vadd.f32 %v1028_v12, %v943_v53 }
 0x37c   : > { %1032 = vst [vmem:[%s473_s22 + $0x8] sm:$0xff] %v1030_v13 }
 0x37d   : > { %1736 = shalt.err (!%p1733_p9)
}
 0x37e   : > { %s1801_s2 = smov 128   ;;  %s1802_s0 = smov 8  }
 0x37f   : > { %1379 = dma.vmem_to_hbm [thread:$0]  (%p1966_p5), %s1047_s1, 256, %s1049_s5, %s1034_s21, %s1801_s2, %s1801_s2, %s1802_s0  }
 0x380 PF: > { %s1063_s23 = sand.u32 1, %s1779_s13   ;;  %p2142_p10 = scmp.ge.s32.totalorder %s1791_s16, 2 }
 0x381   : > { %s1064_s25 = scalar_lea.sflag [#allocation4], %s1063_s23 }
 0x382   : > { %p1405_p12 = pnand %p2142_p10, %p1970_p6 }
 0x384   : > { %p1406_p13 = pneg %p1405_p12 }
 0x386   : > { %1774 = dma.done.wait (%p1406_p13), %s1064_s25, 256  }
 0x387   : > { %1776 = vsyncadd (%p1406_p13), %s1064_s25, 4294967040  ;;  %p24_p0 = scmp.ge.s32.totalorder %s1941_s29, 4   ;;  %s2143_s13 = smov %s1783_s14 }
 0x388   : > { %s2144_s14 = smov %s1787_s15  ;;  %s2145_s15 = smov %s1952_s17 }
 0x389   : > { %s2146_s16 = smov %s1941_s29  ;;  %26 = sbr.rel (!%p24_p0) target bundleno = 13 (0xd), region = 128 }
 0x38e   :  { %1070 = vsyncpa [#allocation3], 1 }
 0x38f   :  { %1072 = vsyncpa [#allocation3 + $0x1], 1 }
 0x390   :  { %1073 = vsyncpa [#allocation6], 1 }
 0x391   :  { %1074 = vsyncpa [#allocation9], 1 }
 0x392   :  { %1075 = vsyncpa [#allocation12], 1 }
 0x393   :  { %1076 = vsyncpa [#allocation4], 1 }
 0x394   :  { %1078 = vsyncpa [#allocation4 + $0x1], 1 }

</bundles_post_ra>
